<compile_context>
chip_gen: v7x
topology: tpu7x:2x2x1
jax: 0.10.0
libtpu: 0.0.40
codegen_flags: <defaults>
</compile_context>

<pallas_src>
import functools
import math

import jax
import jax.numpy as jnp
from jax import lax
from jax.experimental import pallas as pl
from jax.experimental.pallas import tpu as pltpu

BN_EPS = 1e-3
LANE = 128


def _default_vmem_limit():
    # v5e/v6e: 128 MiB physical -> 64 MiB scoped; v7x: 64 MiB physical -> 32 MiB.
    try:
        cap = int(getattr(pltpu.get_tpu_info(), "vmem_capacity_bytes"))
        return int(min(cap // 2, 96 * 1024 * 1024))
    except Exception:
        return 32 * 1024 * 1024


VMEM_LIMIT = _default_vmem_limit()


def _rup(n, m):
    return ((n + m - 1) // m) * m


def _pad2(a, rows, cols):
    return jnp.pad(a, ((0, rows - a.shape[0]), (0, cols - a.shape[1])))


def fold_bn(gamma, beta, mean, var):
    scale = gamma / jnp.sqrt(var + BN_EPS)
    return scale, beta - mean * scale


# ------------------------------ Pallas kernels --------------------------------
def _matmul_kernel(x_ref, w_ref, b_ref, o_ref, *, act):
    # fused: out = act(x @ w + bias)   (BN scale pre-folded into w)
    y = jnp.dot(x_ref[...], w_ref[...], preferred_element_type=jnp.float32)
    y = y + b_ref[...]
    if act == "silu":
        y = y * jax.nn.sigmoid(y)
    o_ref[...] = y.astype(o_ref.dtype)


def _dwconv_se_kernel(*refs, k, s, th_o, wo, n_tiles, halo, halo_rows, inv_hw):
    """Depthwise conv (+folded BN bias) + SiLU, fused global-average-pool and
    fused SE gate (fc1 + SiLU + fc2 + sigmoid) in the last-row-tile epilogue.

    Grid: (batch, row_tiles).  Taps are sliced directly off the padded NHWC
    input block (strided pl.ds when stride > 1); no k^2-duplicated HBM
    intermediate and no full-plane f32 copy."""
    if halo:
        (x_ref, xn_ref, w_ref, b_ref, w1_ref, b1_ref, w2_ref, b2_ref,
         h_ref, g_ref, pool_ref, xbuf_ref) = refs
    else:
        (x_ref, w_ref, b_ref, w1_ref, b1_ref, w2_ref, b2_ref,
         h_ref, g_ref, pool_ref) = refs

    t = pl.program_id(1)

    @pl.when(t == 0)
    def _init():
        pool_ref[...] = jnp.zeros_like(pool_ref)

    if halo:
        # assemble this tile's rows + (k - s) halo rows from the next block
        hb = th_o * s
        xbuf_ref[:, :hb] = x_ref[...]
        xbuf_ref[:, hb:] = xn_ref[:, :halo_rows]
        src = xbuf_ref
    else:
        src = x_ref

    def _sl(start, size):
        if s > 1 and size > 1:
            return pl.ds(start, size, stride=s)
        return pl.ds(start, size)

    w = w_ref[...]                                   # (k*k, C) f32, BN folded
    acc = None
    for dy in range(k):
        for dx in range(k):
            tap = src[:, _sl(dy, th_o), _sl(dx, wo), :].astype(jnp.float32)
            term = tap * w[dy * k + dx: dy * k + dx + 1, :]
            acc = term if acc is None else acc + term
    y = acc + b_ref[...]
    y = y * jax.nn.sigmoid(y)                        # SiLU, f32
    h_ref[...] = y.astype(h_ref.dtype)
    pool_ref[...] += jnp.sum(jnp.sum(y[0], axis=0), axis=0, keepdims=True)

    @pl.when(t == n_tiles - 1)
    def _finalize():
        pooled = (pool_ref[...] * inv_hw).astype(jnp.bfloat16)       # (1, C)
        r = jnp.dot(pooled, w1_ref[...],
                    preferred_element_type=jnp.float32) + b1_ref[...]
        r = r * jax.nn.sigmoid(r)
        gg = jnp.dot(r.astype(jnp.bfloat16), w2_ref[...],
                     preferred_element_type=jnp.float32) + b2_ref[...]
        g_ref[0] = jax.nn.sigmoid(gg)


def _se_proj_body(h_ref, g_ref, w_ref, b_ref):
    h = h_ref[0].astype(jnp.float32)                  # (thw, Cexp)
    hs = (h * g_ref[0]).astype(jnp.bfloat16)          # SE channel scaling
    y = jnp.dot(hs, w_ref[...], preferred_element_type=jnp.float32)
    return y + b_ref[...]


def _se_proj_kernel(h_ref, g_ref, w_ref, b_ref, o_ref):
    o_ref[0] = _se_proj_body(h_ref, g_ref, w_ref, b_ref).astype(o_ref.dtype)


def _se_proj_res_kernel(h_ref, g_ref, w_ref, b_ref, r_ref, o_ref):
    y = _se_proj_body(h_ref, g_ref, w_ref, b_ref) + r_ref[0].astype(jnp.float32)
    o_ref[0] = y.astype(o_ref.dtype)


def _head_kernel(x_ref, wh_ref, bh_ref, wf_ref, bf_ref, o_ref, *, denom):
    # fused per-image: 1x1 head conv + SiLU + global-average-pool + fc + sigmoid
    x = x_ref[0]                                      # (HW, Cin) bf16
    y = jnp.dot(x, wh_ref[...], preferred_element_type=jnp.float32) + bh_ref[...]
    y = y * jax.nn.sigmoid(y)                         # (HW, 1280)
    pooled = jnp.sum(y, axis=0, keepdims=True) * (1.0 / denom)
    z = jnp.dot(pooled.astype(jnp.bfloat16), wf_ref[...],
                preferred_element_type=jnp.float32) + bf_ref[...]
    o_ref[0] = jax.nn.sigmoid(z)


# ----------------------------- layer wrappers ---------------------------------
def _pick_tile_m(m, max_tile):
    """M tile that divides M (no wrapper-side padding on the common path);
    prefer >=2 grid steps so both v7x TensorCores are fed."""
    if m <= max_tile:
        if m >= 16 and m % 16 == 0:
            return m // 2, m
        return m, m
    t = max_tile - (max_tile % 8)
    while t >= 8:
        if m % t == 0:
            return t, m
        t -= 8
    return max_tile, _rup(m, max_tile)   # rare fallback: pad


def matmul_bias_act(x, w, b, act="none", out_dtype=jnp.bfloat16, max_tile_m=1024):
    """out = act(x @ w + b); M gridded/tiled, weights (K,N) stay VMEM-resident."""
    m, k = x.shape
    n = w.shape[1]
    xb = x if x.dtype == jnp.bfloat16 else x.astype(jnp.bfloat16)
    tm, mp = _pick_tile_m(m, max_tile_m)
    assert mp % tm == 0
    if mp != m:
        xb = jnp.pad(xb, ((0, mp - m), (0, 0)))
    out = pl.pallas_call(
        functools.partial(_matmul_kernel, act=act),
        out_shape=jax.ShapeDtypeStruct((mp, n), out_dtype),
        grid=(mp // tm,),
        in_specs=[pl.BlockSpec((tm, k), lambda i: (i, 0)),
                  pl.BlockSpec((k, n), lambda i: (0, 0)),
                  pl.BlockSpec((1, n), lambda i: (0, 0))],
        out_specs=pl.BlockSpec((tm, n), lambda i: (i, 0)),
        compiler_params=pltpu.CompilerParams(
            dimension_semantics=("parallel",), vmem_limit_bytes=VMEM_LIMIT),
    )(xb, w, b)
    return out if mp == m else out[:m]


def _pick_row_tiles(ho, wo, wp, c, k, s, budget=6 * 1024 * 1024):
    """Number of output-row tiles T (dividing ho) so the per-step working set
    (double-buffered bf16 in/out + f32 accumulator) stays under `budget`."""
    for T in range(1, ho + 1):
        if ho % T:
            continue
        th_o = ho // T
        if T > 1 and th_o < max(k, 8):
            break
        th_in = (th_o - 1) * s + k
        step = 4 * th_in * wp * c + 8 * th_o * wo * c
        if step <= budget:
            return T
    return 1


def depthwise_se(x, dw_w, dw_b, se_w1, se_b1, se_w2, se_b2, k, stride):
    """Fused depthwise conv (+BN bias) + SiLU + GAP + SE gate.

    Returns (h, g): h is the SiLU'd depthwise output (bf16 NHWC), g the SE gate
    (B, 1, Cexp) f32.  Row-tiled over H with a (k-s)-row halo when needed."""
    B, H, W, C = x.shape
    s = stride
    pad = (k - 1) // 2
    ho = (H + 2 * pad - k) // s + 1
    wo = (W + 2 * pad - k) // s + 1
    wp = (wo - 1) * s + k
    T = _pick_row_tiles(ho, wo, wp, C, k, s)
    th_o = ho // T
    th_in = (th_o - 1) * s + k
    halo = T > 1
    hb = th_o * s
    hp = (T + 1) * hb if halo else th_in
    csq = se_w1.shape[1]
    assert hp >= H + pad and wp >= W + pad
    xp = jnp.pad(x, ((0, 0), (pad, hp - H - pad), (pad, wp - W - pad), (0, 0)))

    in_specs = [pl.BlockSpec((1, hb if halo else th_in, wp, C),
                             lambda b, t: (b, t, 0, 0))]
    args = [xp]
    if halo:
        # second view of the same array supplies the (k - s) bottom halo rows
        in_specs.append(pl.BlockSpec((1, hb, wp, C), lambda b, t: (b, t + 1, 0, 0)))
        args.append(xp)
    in_specs += [pl.BlockSpec((k * k, C), lambda b, t: (0, 0)),
                 pl.BlockSpec((1, C), lambda b, t: (0, 0)),
                 pl.BlockSpec((C, csq), lambda b, t: (0, 0)),
                 pl.BlockSpec((1, csq), lambda b, t: (0, 0)),
                 pl.BlockSpec((csq, C), lambda b, t: (0, 0)),
                 pl.BlockSpec((1, C), lambda b, t: (0, 0))]
    args += [dw_w, dw_b, se_w1, se_b1, se_w2, se_b2]
    scratch = [pltpu.VMEM((1, C), jnp.float32)]
    if halo:
        scratch.append(pltpu.VMEM((1, th_in, wp, C), jnp.bfloat16))

    h_out, g = pl.pallas_call(
        functools.partial(_dwconv_se_kernel, k=k, s=s, th_o=th_o, wo=wo,
                          n_tiles=T, halo=halo, halo_rows=k - s,
                          inv_hw=1.0 / float(ho * wo)),
        out_shape=(jax.ShapeDtypeStruct((B, ho, wo, C), jnp.bfloat16),
                   jax.ShapeDtypeStruct((B, 1, C), jnp.float32)),
        grid=(B, T),
        in_specs=in_specs,
        out_specs=(pl.BlockSpec((1, th_o, wo, C), lambda b, t: (b, t, 0, 0)),
                   pl.BlockSpec((1, 1, C), lambda b, t: (b, 0, 0))),
        scratch_shapes=scratch,
        compiler_params=pltpu.CompilerParams(
            dimension_semantics=("parallel", "arbitrary"),
            vmem_limit_bytes=VMEM_LIMIT),
    )(*args)
    return h_out, g


def _pick_hw_tile(hw):
    if hw <= 1024:
        return hw
    t = 1024
    while t >= 16:
        if hw % t == 0:
            return t
        t -= 16
    return hw


def se_scale_project_residual(h, g, w, b, res=None):
    """Fused: (h * SE-gate) @ proj_w + bias [+ residual]  -> bf16 NHWC output."""
    B, H, W, Ce = h.shape
    Co = w.shape[1]
    hw = H * W
    thw = _pick_hw_tile(hw)
    h2 = h.reshape(B, hw, Ce)
    specs = [pl.BlockSpec((1, thw, Ce), lambda bb, t: (bb, t, 0)),
             pl.BlockSpec((1, 1, Ce), lambda bb, t: (bb, 0, 0)),
             pl.BlockSpec((Ce, Co), lambda bb, t: (0, 0)),
             pl.BlockSpec((1, Co), lambda bb, t: (0, 0))]
    args = [h2, g, w, b]
    kern = _se_proj_kernel
    if res is not None:
        specs.append(pl.BlockSpec((1, thw, Co), lambda bb, t: (bb, t, 0)))
        args.append(res.reshape(B, hw, Co))
        kern = _se_proj_res_kernel
    out = pl.pallas_call(
        kern,
        out_shape=jax.ShapeDtypeStruct((B, hw, Co), jnp.bfloat16),
        grid=(B, hw // thw),
        in_specs=specs,
        out_specs=pl.BlockSpec((1, thw, Co), lambda bb, t: (bb, t, 0)),
        compiler_params=pltpu.CompilerParams(
            dimension_semantics=("parallel", "parallel"),
            vmem_limit_bytes=VMEM_LIMIT),
    )(*args)
    return out.reshape(B, H, W, Co)


def head_classifier(x, wh, bh, wf, bf):
    B, H, W, C = x.shape
    hw = H * W
    x2 = x.reshape(B, hw, C)
    out = pl.pallas_call(
        functools.partial(_head_kernel, denom=float(hw)),
        out_shape=jax.ShapeDtypeStruct((B, 1, LANE), jnp.float32),
        grid=(B,),
        in_specs=[pl.BlockSpec((1, hw, C), lambda bb: (bb, 0, 0)),
                  pl.BlockSpec(wh.shape, lambda bb: (0, 0)),
                  pl.BlockSpec((1, wh.shape[1]), lambda bb: (0, 0)),
                  pl.BlockSpec(wf.shape, lambda bb: (0, 0)),
                  pl.BlockSpec((1, wf.shape[1]), lambda bb: (0, 0))],
        out_specs=pl.BlockSpec((1, 1, LANE), lambda bb: (bb, 0, 0)),
        compiler_params=pltpu.CompilerParams(
            dimension_semantics=("parallel",), vmem_limit_bytes=VMEM_LIMIT),
    )(x2, wh, bh, wf, bf)
    return out[:, 0, :1]  # the real logit lives in column 0 of the padded lane dim


def stem_conv(x, w_flat, b):
    # 3x3 stride-2 conv via im2col + fused matmul.  Cin is tiny (1), so the
    # patch matrix is small glue compared to the depthwise path.
    # TODO(synk): build the im2col patches inside a kernel (strided tap slices
    # of the padded image) to avoid the poorly lane-packed HBM intermediate at
    # ImageNet-scale resolutions.
    B, H, W, Cin = x.shape
    k, s, pad = 3, 2, 1
    ho = (H + 2 * pad - k) // s + 1
    wo = (W + 2 * pad - k) // s + 1
    xp = jnp.pad(x, ((0, 0), (pad, pad), (pad, pad), (0, 0)))
    taps = []
    for dy in range(k):
        for dx in range(k):
            taps.append(lax.slice(
                xp, (0, dy, dx, 0),
                (B, dy + s * (ho - 1) + 1, dx + s * (wo - 1) + 1, Cin),
                (1, s, s, 1)))
    patches = jnp.concatenate(taps, axis=-1).reshape(B * ho * wo, k * k * Cin)
    y = matmul_bias_act(patches, w_flat, b, act="silu")
    return y.reshape(B, ho, wo, w_flat.shape[1])


# ----------------------------- parameters -------------------------------------
# EfficientNet-B0 stage config: (expand_ratio, kernel, stride, out_channels, repeats)
B0_CFG = [
    (1, 3, 1, 16, 1),
    (6, 3, 2, 24, 2),
    (6, 5, 2, 40, 2),
    (6, 3, 2, 80, 3),
    (6, 5, 1, 112, 3),
    (6, 5, 2, 192, 4),
    (6, 3, 1, 320, 1),
]


def init_params(key, in_channels=1):
    """Raw (PyTorch-like, unpadded) random parameters — pretrained=False."""
    keys = iter(jax.random.split(key, 256))

    def nk():
        return next(keys)

    def conv(cin, cout, k=1):
        fan = cin * k * k
        return jax.random.normal(nk(), (k, k, cin, cout), jnp.float32) / math.sqrt(fan)

    def bn(c):
        # (gamma, beta, running_mean, running_var) -> folded at prep time (inference)
        return (jnp.ones((c,), jnp.float32), jnp.zeros((c,), jnp.float32),
                jnp.zeros((c,), jnp.float32), jnp.ones((c,), jnp.float32))

    params = {"stem_w": conv(in_channels, 32, 3), "stem_bn": bn(32), "blocks": []}
    cin = 32
    for (exp, k, stride, cout, reps) in B0_CFG:
        for r in range(reps):
            s = stride if r == 0 else 1
            cexp = cin * exp
            csq = max(1, cin // 4)  # SE squeeze from block *input* channels
            blk = {"k": k, "stride": s, "cin": cin, "cout": cout, "expand": None}
            if exp != 1:
                blk["expand"] = (conv(cin, cexp, 1).reshape(cin, cexp), bn(cexp))
            blk["dw_w"] = jax.random.normal(nk(), (k, k, cexp), jnp.float32) / math.sqrt(k * k)
            blk["dw_bn"] = bn(cexp)
            blk["se_w1"] = conv(cexp, csq, 1).reshape(cexp, csq)
            blk["se_b1"] = jnp.zeros((csq,), jnp.float32)
            blk["se_w2"] = conv(csq, cexp, 1).reshape(csq, cexp)
            blk["se_b2"] = jnp.zeros((cexp,), jnp.float32)
            blk["proj"] = (conv(cexp, cout, 1).reshape(cexp, cout), bn(cout))
            params["blocks"].append(blk)
            cin = cout
    params["head_w"] = conv(320, 1280, 1).reshape(320, 1280)
    params["head_bn"] = bn(1280)
    params["fc_w"] = jax.random.normal(nk(), (1280, 1), jnp.float32) / math.sqrt(1280)
    params["fc_b"] = jnp.zeros((1,), jnp.float32)
    return params


def prepare_params(raw):
    """Fold BN into weights, zero-pad channel dims to 128-lane multiples,
    cast MXU weights to bf16; biases / depthwise weights stay f32."""
    bf16 = jnp.bfloat16
    in_ch = raw["stem_w"].shape[2]

    P = {}
    s, b = fold_bn(*raw["stem_bn"])
    wf = (raw["stem_w"] * s).reshape(9 * in_ch, 32)
    P["stem_w"] = _pad2(wf, 9 * in_ch, _rup(32, LANE)).astype(bf16)
    P["stem_b"] = _pad2(b[None, :], 1, _rup(32, LANE))

    P["blocks"] = []
    for blk in raw["blocks"]:
        k, stride, cin, cout = blk["k"], blk["stride"], blk["cin"], blk["cout"]
        cexp = blk["dw_w"].shape[-1]
        csq = blk["se_w1"].shape[1]
        cin_p, cexp_p = _rup(cin, LANE), _rup(cexp, LANE)
        cout_p, csq_p = _rup(cout, LANE), _rup(csq, LANE)
        pb = {"k": k, "stride": stride, "cexp_p": cexp_p,
              "has_res": (stride == 1 and cin == cout)}
        if blk["expand"] is not None:
            w, bnp = blk["expand"]
            s, b = fold_bn(*bnp)
            pb["expand_w"] = _pad2(w * s[None, :], cin_p, cexp_p).astype(bf16)
            pb["expand_b"] = _pad2(b[None, :], 1, cexp_p)
        else:
            pb["expand_w"] = None
        s, b = fold_bn(*blk["dw_bn"])
        pb["dw_w"] = _pad2((blk["dw_w"] * s).reshape(k * k, cexp), k * k, cexp_p)
        pb["dw_b"] = _pad2(b[None, :], 1, cexp_p)
        pb["se_w1"] = _pad2(blk["se_w1"], cexp_p, csq_p).astype(bf16)
        pb["se_b1"] = _pad2(blk["se_b1"][None, :], 1, csq_p)
        pb["se_w2"] = _pad2(blk["se_w2"], csq_p, cexp_p).astype(bf16)
        pb["se_b2"] = _pad2(blk["se_b2"][None, :], 1, cexp_p)
        w, bnp = blk["proj"]
        s, b = fold_bn(*bnp)
        pb["proj_w"] = _pad2(w * s[None, :], cexp_p, cout_p).astype(bf16)
        pb["proj_b"] = _pad2(b[None, :], 1, cout_p)
        P["blocks"].append(pb)

    s, b = fold_bn(*raw["head_bn"])
    P["head_w"] = _pad2(raw["head_w"] * s[None, :], _rup(320, LANE), 1280).astype(bf16)
    P["head_b"] = b[None, :]
    P["fc_w"] = _pad2(raw["fc_w"], 1280, LANE).astype(bf16)
    P["fc_b"] = _pad2(raw["fc_b"][None, :], 1, LANE)
    return P


# ----------------------------- forward pass ------------------------------------
def efficientnet_forward(params, x_nchw):
    # accepts NCHW like the PyTorch module; kernels run on NHWC (C on the lanes)
    x = jnp.transpose(x_nchw.astype(jnp.float32), (0, 2, 3, 1))

    # stem: 3x3 s2 conv + folded-BN + SiLU
    x = stem_conv(x, params["stem_w"], params["stem_b"])

    # MBConv blocks
    for blk in params["blocks"]:
        res = x if blk["has_res"] else None
        h = x
        if blk["expand_w"] is not None:
            B, H, W, C = h.shape
            h = matmul_bias_act(h.reshape(B * H * W, C),
                                blk["expand_w"], blk["expand_b"], act="silu")
            h = h.reshape(B, H, W, blk["cexp_p"])
        h, g = depthwise_se(h, blk["dw_w"], blk["dw_b"],
                            blk["se_w1"], blk["se_b1"],
                            blk["se_w2"], blk["se_b2"],
                            blk["k"], blk["stride"])
        x = se_scale_project_residual(h, g, blk["proj_w"], blk["proj_b"], res)

    # head 1x1 conv + BN + SiLU -> GAP -> fc(1280,1) -> sigmoid (fully fused)
    # TODO(synk): dropout / stochastic depth and BN batch statistics (train
    # mode) are treated as inference-mode identity / folded running stats.
    out = head_classifier(x, params["head_w"], params["head_b"],
                          params["fc_w"], params["fc_b"])
    return out  # (B, 1) in [0, 1]


# ----------------------- pure-JAX reference (validation) -----------------------
def reference_forward(raw, x_nchw):
    """f32 reference of the same architecture (no Pallas), for numerics check."""
    silu = lambda v: v * jax.nn.sigmoid(v)

    def bn(v, bnp):
        sc, bi = fold_bn(*bnp)
        return v * sc + bi

    def conv(v, w, stride, pad, groups=1):
        return lax.conv_general_dilated(
            v, w, (stride, stride), [(pad, pad), (pad, pad)],
            dimension_numbers=("NHWC", "HWIO", "NHWC"),
            feature_group_count=groups)

    x = jnp.transpose(x_nchw.astype(jnp.float32), (0, 2, 3, 1))
    x = silu(bn(conv(x, raw["stem_w"], 2, 1), raw["stem_bn"]))
    for blk in raw["blocks"]:
        k, s = blk["k"], blk["stride"]
        res = x if (s == 1 and blk["cin"] == blk["cout"]) else None
        h = x
        if blk["expand"] is not None:
            w, bnp = blk["expand"]
            h = silu(bn(jnp.einsum("bhwc,cd->bhwd", h, w), bnp))
        cexp = blk["dw_w"].shape[-1]
        h = conv(h, blk["dw_w"][:, :, None, :], s, (k - 1) // 2, groups=cexp)
        h = silu(bn(h, blk["dw_bn"]))
        pooled = jnp.mean(h, axis=(1, 2))
        r = silu(pooled @ blk["se_w1"] + blk["se_b1"])
        g = jax.nn.sigmoid(r @ blk["se_w2"] + blk["se_b2"])
        h = h * g[:, None, None, :]
        w, bnp = blk["proj"]
        h = bn(jnp.einsum("bhwc,cd->bhwd", h, w), bnp)
        x = h + res if res is not None else h
    x = silu(bn(jnp.einsum("bhwc,cd->bhwd", x, raw["head_w"]), raw["head_bn"]))
    pooled = jnp.mean(x, axis=(1, 2))
    return jax.nn.sigmoid(pooled @ raw["fc_w"] + raw["fc_b"])


# ----------------------------------- main ---------------------------------------
if __name__ == "__main__":
    key = jax.random.PRNGKey(0)
    pkey, xkey = jax.random.split(key)
    raw = init_params(pkey, in_channels=1)
    params = prepare_params(raw)
    # NCHW input, in_channels=1 per the module default; 16x16 spatial keeps it small.
    x = jax.random.normal(xkey, (2, 1, 16, 16), jnp.float32)

    y = jax.block_until_ready(efficientnet_forward(params, x))
    assert y.shape == (2, 1)
    assert bool(jnp.all(jnp.isfinite(y))) and bool(jnp.all((y >= 0) & (y <= 1)))

    # numerics check vs pure-JAX f32 reference (bf16 activation/weight tolerance)
    y_ref = jax.block_until_ready(reference_forward(raw, x))
    assert float(jnp.max(jnp.abs(y - y_ref))) < 0.1

    print("KERNEL_OK")
</pallas_src>

<mosaic_0001>
module attributes {stable_mosaic.version = 11 : i64} {
  func.func @_matmul_kernel(%arg0: i32, %arg1: memref<64x9xbf16, #tpu.memory_space<vmem>>, %arg2: memref<9x128xbf16, #tpu.memory_space<vmem>>, %arg3: memref<1x128xf32, #tpu.memory_space<vmem>>, %arg4: memref<64x128xbf16, #tpu.memory_space<vmem>>) attributes {dimension_semantics = [#tpu.dimension_semantics<parallel>], iteration_bounds = array<i64: 2>, scalar_prefetch = 0 : i64, scratch_operands = 0 : i64, tpu.core_type = #tpu.core_type<tc>, window_params = [{transform_indices = @transform_0, window_bounds = array<i64: 64, 9>}, {pipeline_mode = #tpu.pipeline_mode<synchronous>, transform_indices = @transform_1, window_bounds = array<i64: 9, 128>}, {pipeline_mode = #tpu.pipeline_mode<synchronous>, transform_indices = @transform_2, window_bounds = array<i64: 1, 128>}, {transform_indices = @transform_3, window_bounds = array<i64: 64, 128>}]} {
    %c0 = arith.constant 0 : index
    %c0_0 = arith.constant 0 : index
    %0 = vector.load %arg1[%c0, %c0_0] : memref<64x9xbf16, #tpu.memory_space<vmem>>, vector<64x9xbf16>
    %c0_1 = arith.constant 0 : index
    %c0_2 = arith.constant 0 : index
    %1 = vector.load %arg2[%c0_1, %c0_2] : memref<9x128xbf16, #tpu.memory_space<vmem>>, vector<9x128xbf16>
    %cst = arith.constant dense<0.000000e+00> : vector<64x128xf32>
    %2 = tpu.matmul %0, %1, %cst {dimension_numbers = #tpu.dot_dimension_numbers<[1], [0], [0], [1], [0, 0, 1, 1], [], []>} : vector<64x9xbf16>, vector<9x128xbf16>, vector<64x128xf32> -> vector<64x128xf32>
    %c0_3 = arith.constant 0 : index
    %c0_4 = arith.constant 0 : index
    %3 = vector.load %arg3[%c0_3, %c0_4] : memref<1x128xf32, #tpu.memory_space<vmem>>, vector<1x128xf32>
    %4 = vector.broadcast %3 : vector<1x128xf32> to vector<64x128xf32>
    %5 = arith.addf %2, %4 : vector<64x128xf32>
    %6 = arith.negf %5 : vector<64x128xf32>
    %7 = math.exp %6 : vector<64x128xf32>
    %cst_5 = arith.constant 1.000000e+00 : f32
    %8 = vector.broadcast %cst_5 : f32 to vector<64x128xf32>
    %9 = arith.addf %8, %7 : vector<64x128xf32>
    %10 = arith.divf %8, %9 : vector<64x128xf32>
    %11 = arith.mulf %5, %10 : vector<64x128xf32>
    %12 = arith.truncf %11 : vector<64x128xf32> to vector<64x128xbf16>
    %c0_6 = arith.constant 0 : index
    %c0_7 = arith.constant 0 : index
    %13 = vector.load %arg4[%c0_6, %c0_7] : memref<64x128xbf16, #tpu.memory_space<vmem>>, vector<64x128xbf16>
    tpu.vector_store %arg4[%c0_6, %c0_7], %12 {strides = array<i32>} : memref<64x128xbf16, #tpu.memory_space<vmem>>, vector<64x128xbf16>,
    return
  }
  func.func @transform_0(%arg0: i32) -> (i32, i32) {
    %c0_i32 = arith.constant 0 : i32
    %c0_i32_0 = arith.constant 0 : i32
    return %arg0, %c0_i32 : i32, i32
  }
  func.func @transform_1(%arg0: i32) -> (i32, i32) {
    %c0_i32 = arith.constant 0 : i32
    %c0_i32_0 = arith.constant 0 : i32
    %c0_i32_1 = arith.constant 0 : i32
    return %c0_i32, %c0_i32_0 : i32, i32
  }
  func.func @transform_2(%arg0: i32) -> (i32, i32) {
    %c0_i32 = arith.constant 0 : i32
    %c0_i32_0 = arith.constant 0 : i32
    %c0_i32_1 = arith.constant 0 : i32
    return %c0_i32, %c0_i32_0 : i32, i32
  }
  func.func @transform_3(%arg0: i32) -> (i32, i32) {
    %c0_i32 = arith.constant 0 : i32
    %c0_i32_0 = arith.constant 0 : i32
    return %arg0, %c0_i32 : i32, i32
  }
}

</mosaic_0001>

<bundles_post_ra>
// kernel: tpu_custom_call.1
= control target key start
LH: loop header
LB: loop body
LE: loop exit
PB: predicated region body
PF: predicated region fallthrough
CT: control target
= control target key end

     0   :  { %8 = vsyncpa [#allocation3], 0  ;;  %s854_s0 = inlined_call_operand.vmem [shape: bf16[128,9], index: 0, kind: input, shape index: {}]   ;;  %s855_s1 = inlined_call_operand.vmem [shape: bf16[9,128], index: 1, kind: input, shape index: {}]   ;;  %s856_s2 = inlined_call_operand.vmem [shape: f32[1,128], index: 2, kind: input, shape index: {}]   ;;  %s857_s3 = inlined_call_operand.hbm [shape: bf16[128,128], index: 3, kind: output, shape index: {}]  }
   0x1   :  { %10 = vsyncpa [#allocation3 + $0x1], 0  ;;  %s726_s12 = smov 0   ;;  %s728_s13 = smov 0  }
   0x2   :  { %s730_s14 = smov 0   ;;  %s732_s15 = smov 0  }
   0x3 LB: > { %s747_s16 = sadd.s32 4294967295, %s700_s15   ;;  %s472_s17 = sadd.s32 4294967294, %s700_s15   ;;  %s700_s15 = sphi %s732_s15, %s863_s15   ;;  %s696_s14 = sphi %s730_s14, %s862_s14   ;;  %s692_s13 = sphi %s728_s13, %s861_s13   ;;  %s688_s12 = sphi %s726_s12, %s860_s12  }
   0x4   : > { %s751_s18 = sadd.s32 1, %s700_s15   ;;  %s91_s19 = sadd.s32 1, %s696_s14 }
   0x5   : > { %s88_s20 = ssub.s32 %s700_s15, %s751_s18  ;;  %p101_p0 = scmp.ne.s32.totalorder %s696_s14, %s692_s13 }
   0x6   : > { %p89_p1 = scmp.eq.s32.totalorder %s88_s20, 0  ;;  %p102_p2 = scmp.eq.s32.totalorder %s747_s16, 1 }
   0x7   : > { %p107_p3 = scmp.ne.s32.totalorder %s692_s13, %s688_s12  ;;  %p108_p4 = scmp.eq.s32.totalorder %s472_s17, 1 }
   0x8   : > { %s762_s21 = scalar_select %p89_p1, %s696_s14, %s91_s19  }
   0x9   : > { %p764_p5 = por %p102_p2, %p101_p0  ;;  %p768_p6 = por %p108_p4, %p107_p3 }
   0xa   : > { %p475_p7 = scmp.ge.s32.totalorder %s700_s15, 1  ;;  %p141_p8 = scmp.lt.s32.totalorder %s700_s15, 3 }
   0xc   : > { %p142_p9 = pnand %p475_p7, %p141_p8 }
   0xd   : > { %v601_v0 = vld [vmem:[%s855_s1] sm:$0x1f] (!%p142_p9)   ;;  %vm228_vm0 = vcmask (!%p142_p9), 1043456   ;;  %vm229_vm1 = vcmask (!%p142_p9), 1044480   ;;  %s477_s26 = sshll.u32 (!%p142_p9), %s747_s16, 3  ;;  %v702_v1 = vmov (!%p142_p9), 65535  }
   0xe   : > { %145 = sbr.rel (%p142_p9) target bundleno = 292 (0x124), region = 32  ;;  %v230_v2 = vsel (!%p142_p9), %vm228_vm0, 4294967295, %v702_v1  ;;  %p166_p10 = scmp.lt.s32.totalorder (!%p142_p9), %s477_s26, 15  ;;  %vm215_vm2 = vcmask (!%p142_p9), 72704   ;;  %v479_v9 = vld [vmem:[%s856_s2] ss:$0 sm:$0xff] (!%p142_p9) }
   0xf   : > { %v231_v3 = vsel (!%p142_p9), %vm229_vm1, %v230_v2, 0  ;;  %s162_s6 = sand.u32 (!%p142_p9), 1, %s692_s13   ;;  %s518_s10 = sshll.u32 (!%p142_p9), %s747_s16, 9 }
  0x10   : > { %v233_v4 = vand.u32 (!%p142_p9), %v601_v0, %v231_v3  ;;  %s476_s7 = sshll.u32 (!%p142_p9), %s162_s6, 5  ;;  %s809_s17 = scalar_lea.hbm (!%p142_p9), %s857_s3, %s518_s10 }
  0x11   : > { %s164_s8 = scalar_lea.vmem (!%p142_p9), [#allocation2], %s476_s7  ;;  %s813_s19 = scalar_lea.sflag (!%p142_p9), [#allocation3], %s162_s6 }
  0x12   : > { %547 = vmatprep.subr.bf16.mxu0 (!%p142_p9), %v233_v4  ;;  %557 = vmatprep.subr.bf16.mxu1 (!%p142_p9), %v233_v4  ;;  %s410_s9 = sshll.u32 (!%p142_p9), %s164_s8, 4  ;;  %s703_s24 = smov (!%p142_p9), [#allocation2]   ;;  %s804_s9 = int_to_ptr.vmem [resolvable:$true] %s410_s9 }
  0x13   : > { %548 = vmatpush3.bf16.msra.mxu0 (!%p142_p9), %v233_v4  ;;  %558 = vmatpush3.bf16.msra.mxu1 (!%p142_p9), %v233_v4  ;;  %s638_s20 = scalar_lea.vmem (!%p142_p9), %s804_s9, 512  ;;  %s642_s25 = sshll.u32 (!%p142_p9), %s703_s24, 4  ;;  %s643_s25 = int_to_ptr.vmem [resolvable:$false] %s642_s25 }
  0x14   : > { %p639_p11 = scmp.ne.s32.totalorder (!%p142_p9), %s804_s9, %s638_s20  ;;  %p645_p0 = scmp.lt.s32.totalorder (!%p142_p9), %s804_s9, %s643_s25 }
  0x15   : > { %s865_s26 = smov (!%p166_p10, %s477_s26), 15 }
  0x16   : > { %s478_s27 = sshll.u32 %s865_s26, 2  ;;  %p640_p12 = pnand %p639_p11, %p764_p5 }
  0x17   : > { %s169_s30 = scalar_lea.vmem %s854_s0, %s478_s27  ;;  %s644_s26 = scalar_lea.vmem %s643_s25, 1024 }
  0x18   : > { %v602_v5 = vld [vmem:[%s169_s30] sm:$0xff]   ;;  %v603_v6 = vld [vmem:[%s169_s30 + $0x10] sm:$0xff]   ;;  %v604_v7 = vld [vmem:[%s169_s30 + $0x8] sm:$0xff]   ;;  %p641_p13 = pneg %p640_p12  ;;  %p646_p1 = scmp.lt.s32.totalorder %s644_s26, %s638_s20 }
  0x19   : > { %549 = vmatprep.mubr.msk.bf16.mxu0 %vm215_vm2, %v602_v5  ;;  %553 = vmatprep.mubr.msk.bf16.mxu1 %vm215_vm2, %v603_v6  ;;  %v605_v8 = vld [vmem:[%s169_s30 + $0x18] sm:$0xff]  }
  0x1a   : > { %550 = vmatmul.mubr.msk.bf16.vlgmr.msra.gmra.mrb[0].mxu0 %vm215_vm2, %v604_v7  ;;  %554 = vmatmul.mubr.msk.bf16.vlgmr.msra.gmra.mrb[0].mxu1 %vm215_vm2, %v605_v8  ;;  %p647_p2 = por %p646_p1, %p645_p0 }
  0x1c   : > { %p648_p3 = pnand %p647_p2, %p641_p13 }
  0xed   : > { %v551_v10 = vpop.f32.mrb[0].mxu0  ;;  %v555_v12 = vpop.f32.mrb[0].mxu1 }
  0xee   : > { %v784_v11 = vadd.f32 %v551_v10, %v479_v9  ;;  %v269_v13 = vpop.f32.mrb[1].mxu0  ;;  %v786_v14 = vadd.f32 %v555_v12, %v479_v9  ;;  %v285_v16 = vpop.f32.mrb[1].mxu1 }
  0xef   : > { %v788_v15 = vadd.f32 %v479_v9, %v269_v13  ;;  %v552_v17 = vpop.f32.mrb[2].mxu0  ;;  %v791_v19 = vadd.f32 %v479_v9, %v285_v16  ;;  %v556_v21 = vpop.f32.mrb[2].mxu1 }
  0xf0   : > { %v491_v18 = vmul.f32 -1.442695, %v784_v11  ;;  %v281_v20 = vadd.f32 %v552_v17, %v479_v9  ;;  %v272_v22 = vpop.f32.mrb[3].mxu0  ;;  %v495_v23 = vmul.f32 -1.442695, %v786_v14  ;;  %v297_v25 = vadd.f32 %v556_v21, %v479_v9  ;;  %v288_v27 = vpop.f32.mrb[3].mxu1 }
  0xf1   : > { %v489_v24 = vmul.f32 -1.442695, %v788_v15  ;;  %v273_v26 = vadd.f32 %v479_v9, %v272_v22  ;;  %v493_v28 = vmul.f32 -1.442695, %v791_v19  ;;  %v289_v30 = vadd.f32 %v479_v9, %v288_v27 }
  0xf2   : > { %606 = vpow2.f32 %v491_v18  ;;  %v492_v29 = vmul.f32 -1.442695, %v281_v20  ;;  %v496_v31 = vmul.f32 -1.442695, %v297_v25 }
  0xf3   : > { %608 = vpow2.f32 %v495_v23  ;;  %v490_v32 = vmul.f32 -1.442695, %v273_v26  ;;  %v494_v33 = vmul.f32 -1.442695, %v289_v30 }
  0xf4   : > { %610 = vpow2.f32 %v489_v24 }
  0xf5   : > { %612 = vpow2.f32 %v493_v28 }
  0xf6   : > { %614 = vpow2.f32 %v492_v29 }
  0xf7   : > { %616 = vpow2.f32 %v496_v31 }
  0xf8   : > { %618 = vpow2.f32 %v490_v32 }
  0xf9   : > { %620 = vpow2.f32 %v494_v33 }
  0xfc   : > { %v607_v34 = vpop.eup %606 }
  0xfd   : > { %v609_v35 = vpop.eup %608  ;;  %v326_v36 = vadd.f32 1.0, %v607_v34 }
  0xfe   : > { %v611_v37 = vpop.eup %610  ;;  %v330_v38 = vadd.f32 1.0, %v609_v35 }
  0xff   : > { %v613_v39 = vpop.eup %612  ;;  %622 = vrcp.f32 %v326_v36  ;;  %v324_v40 = vadd.f32 1.0, %v611_v37 }
 0x100   : > { %v615_v41 = vpop.eup %614  ;;  %624 = vrcp.f32 %v330_v38  ;;  %v328_v42 = vadd.f32 1.0, %v613_v39 }
 0x101   : > { %v617_v43 = vpop.eup %616  ;;  %626 = vrcp.f32 %v324_v40  ;;  %v327_v44 = vadd.f32 1.0, %v615_v41 }
 0x102   : > { %v619_v45 = vpop.eup %618  ;;  %628 = vrcp.f32 %v328_v42  ;;  %v331_v46 = vadd.f32 1.0, %v617_v43 }
 0x103   : > { %v621_v47 = vpop.eup %620  ;;  %630 = vrcp.f32 %v327_v44  ;;  %v325_v48 = vadd.f32 1.0, %v619_v45 }
 0x104   : > { %632 = vrcp.f32 %v331_v46  ;;  %v329_v49 = vadd.f32 1.0, %v621_v47 }
 0x105   : > { %634 = vrcp.f32 %v325_v48 }
 0x106   : > { %636 = vrcp.f32 %v329_v49 }
 0x109   : > { %v623_v50 = vpop.eup %622 }
 0x10a   : > { %v625_v51 = vpop.eup %624  ;;  %v350_v56 = vmul.f32 %v623_v50, %v784_v11 }
 0x10b   : > { %v627_v52 = vpop.eup %626  ;;  %v354_v59 = vmul.f32 %v625_v51, %v786_v14 }
 0x10c   : > { %v629_v53 = vpop.eup %628  ;;  %v348_v62 = vmul.f32 %v627_v52, %v788_v15 }
 0x10d   : > { %v631_v54 = vpop.eup %630  ;;  %v352_v1 = vmul.f32 %v629_v53, %v791_v19 }
 0x10e   : > { %v633_v55 = vpop.eup %632  ;;  %v351_v57 = vmul.f32 %v631_v54, %v281_v20 }
 0x10f   : > { %v635_v58 = vpop.eup %634  ;;  %v355_v60 = vmul.f32 %v633_v55, %v297_v25 }
 0x110   : > { %v637_v61 = vpop.eup %636  ;;  %v527_v63 = vpack.c.bf16 %v351_v57, %v350_v56  ;;  %v349_v0 = vmul.f32 %v635_v58, %v273_v26 }
 0x111   : > { %v537_v2 = vpack.c.bf16 %v355_v60, %v354_v59  ;;  %v353_v3 = vmul.f32 %v637_v61, %v289_v30 }
 0x112   : > { %539 = vst [vmem:[%s164_s8 + $0x8] sm:$0xff] %v527_v63   ;;  %v522_v4 = vpack.c.bf16 %v349_v0, %v348_v62 }
 0x113   : > { %541 = vst [vmem:[%s164_s8 + $0x18] sm:$0xff] %v537_v2   ;;  %v532_v5 = vpack.c.bf16 %v353_v3, %v352_v1 }
 0x114   : > { %523 = vst [vmem:[%s164_s8] sm:$0xff] %v522_v4  }
 0x115   : > { %540 = vst [vmem:[%s164_s8 + $0x10] sm:$0xff] %v532_v5  }
 0x116   : > { %651 = shalt.err (!%p648_p3)
}
 0x117   : > { %s652_s27 = scalar_lea.hbm %s809_s17, 512  ;;  %s656_s30 = scalar_lea.hbm %s857_s3, 1024 }
 0x118   : > { %p653_p4 = scmp.ne.s32.totalorder %s809_s17, %s652_s27  ;;  %p657_p9 = scmp.lt.u32.totalorder %s809_s17, %s857_s3 }
 0x119   : > { %p658_p10 = scmp.lt.u32.totalorder %s656_s30, %s652_s27  ;;  %p660_p12 = scmp.lt.u32.totalorder %s652_s27, %s809_s17 }
 0x11a   : > { %p654_p7 = pnand %p653_p4, %p764_p5 }
 0x11b   : > { %p659_p11 = por %p658_p10, %p657_p9 }
 0x11c   : > { %p655_p8 = pneg %p654_p7 }
 0x11d   : > { %p661_p13 = por %p660_p12, %p659_p11 }
 0x11f   : > { %p662_p0 = pnand %p661_p13, %p655_p8 }
 0x121   : > { %665 = shalt.err (!%p662_p0)
}
 0x122   : > { %s704_s6 = smov 64   ;;  %s705_s7 = smov 4  }
 0x123   : > { %559 = dma.vmem_to_hbm [thread:$0]  (%p764_p5), %s804_s9, 512, %s809_s17, %s813_s19, %s704_s6, %s704_s6, %s705_s7  }
 0x124 PF: > { %p565_p1 = scmp.ge.s32.totalorder %s700_s15, 2  ;;  %s425_s8 = sand.u32 1, %s688_s12  }
 0x125   : > { %s426_s10 = scalar_lea.sflag [#allocation3], %s425_s8 }
 0x126   : > { %p562_p2 = pnand %p565_p1, %p768_p6 }
 0x128   : > { %683 = dma.done.wait (!%p562_p2), %s426_s10, 512  }
 0x129   : > { %685 = vsyncadd (!%p562_p2), %s426_s10, 4294966784  ;;  %p13_p3 = scmp.ge.s32.totalorder %s751_s18, 4   ;;  %s860_s12 = smov %s692_s13 }
 0x12a   : > { %s861_s13 = smov %s696_s14  ;;  %s862_s14 = smov %s762_s21 }
 0x12b   : > { %s863_s15 = smov %s751_s18  ;;  %15 = sbr.rel (!%p13_p3) target bundleno = 3 (0x3), region = 67 }
 0x132   :  { %431 = vsyncpa [#allocation3], 1 }
 0x133   :  { %433 = vsyncpa [#allocation3 + $0x1], 1 }

</bundles_post_ra>
